<compile_context>
chip_gen: v7x
topology: tpu7x:2x2x1
jax: 0.10.0
libtpu: 0.0.40
codegen_flags: <defaults>
</compile_context>

<pallas_src>
import functools

import jax
import jax.numpy as jnp
from jax.experimental import pallas as pl
from jax.experimental.pallas import tpu as pltpu


# ---------------------------- Pallas kernel ----------------------------------
def _shuffle_gather_kernel(idx_ref, x_ref, o_ref):
    """Gather kept rows of x_ref named by idx_ref for a block of batch elems.

    idx_ref: (Bblk, rem, 1) int32   kept forward indexes
    x_ref  : (Bblk, N,   C)         full patch sequences
    o_ref  : (Bblk, rem, C)         gathered (shuffled, truncated) rows
    """
    bblk, n_patches, _ = x_ref.shape
    rem = o_ref.shape[1]

    idx = idx_ref[...]                                             # (Bblk, rem, 1)
    cols = jax.lax.broadcasted_iota(jnp.int32, (bblk, rem, n_patches), 2)
    # One-hot selection in the *input* dtype: exact for 0/1, halves vreg/VMEM
    # pressure and runs the MXU at native bf16 rate for bf16 inputs.
    sel = (cols == idx).astype(x_ref.dtype)                        # (Bblk, rem, N)
    # jnp.dot is not batched; einsum lowers to a batched MXU matmul.
    gathered = jnp.einsum('brn,bnc->brc', sel, x_ref[...],
                          preferred_element_type=jnp.float32)
    o_ref[...] = gathered.astype(o_ref.dtype)


def _gather_remaining(patches, kept_indexes, *, block_b=4):
    """patches: (B, N, C); kept_indexes: (B, rem) int32 -> (B, rem, C)."""
    B, N, C = patches.shape
    rem = kept_indexes.shape[1]

    LANE = 128
    pad_c = (-C) % LANE                      # lane-dense last dim (full-width vst)
    bblk = max(1, min(block_b, B))           # batch elems per grid step
    pad_b = (-B) % bblk                      # pad B to a multiple of Bblk

    x = patches
    idx = kept_indexes.astype(jnp.int32)
    if pad_c:
        x = jnp.pad(x, ((0, 0), (0, 0), (0, pad_c)))
    if pad_b:
        x = jnp.pad(x, ((0, pad_b), (0, 0), (0, 0)))
        idx = jnp.pad(idx, ((0, pad_b), (0, 0)))    # pad index 0 is always in-range
    Bp, Cp = B + pad_b, C + pad_c
    idx3 = idx.reshape(Bp, rem, 1)

    out = pl.pallas_call(
        _shuffle_gather_kernel,
        grid=(Bp // bblk,),
        in_specs=[
            pl.BlockSpec((bblk, rem, 1), lambda b: (b, 0, 0)),
            pl.BlockSpec((bblk, N, Cp), lambda b: (b, 0, 0)),
        ],
        out_specs=pl.BlockSpec((bblk, rem, Cp), lambda b: (b, 0, 0)),
        out_shape=jax.ShapeDtypeStruct((Bp, rem, Cp), patches.dtype),
        compiler_params=pltpu.CompilerParams(
            dimension_semantics=("parallel",)),     # v7x: shard grid over 2 TCs
    )(idx3, x)

    if pad_b or pad_c:
        out = out[:B, :, :C]
    return out


# ----------------------------- plain-JAX glue ---------------------------------
def random_indexes(key, batch_size, num_patches):
    """Batched random permutations + inverse permutations (no Python loop)."""
    keys = jax.random.split(key, batch_size)
    forward = jax.vmap(
        lambda k: jax.random.permutation(k, num_patches))(keys).astype(jnp.int32)
    backward = jnp.argsort(forward, axis=-1).astype(jnp.int32)
    return forward, backward


@functools.partial(jax.jit, static_argnames=("ratio",))
def patch_shuffle_forward(patches, forward_indexes, backward_indexes, *, ratio):
    """PatchShuffle.forward given pre-drawn permutation indexes."""
    B, N, _ = patches.shape
    num_remaining = int(N * (1.0 - ratio))
    # Gathering only the first `num_remaining` forward indexes is equivalent to
    # the reference's full gather followed by [:, :num_remaining, :].
    remaining = _gather_remaining(patches, forward_indexes[:, :num_remaining])
    return remaining, forward_indexes, backward_indexes


# ---------------------------------- main --------------------------------------
if __name__ == "__main__":
    key = jax.random.PRNGKey(0)
    k_patch, k_perm = jax.random.split(key)

    # Small but representative: 64 patches, lane-dense embed dim 128.
    # B=6 with Bblk=4 exercises the partial-block padding path and gives a
    # grid of 2 steps (both v7x TensorCores get work).
    B, NUM_PATCHES, EMB_DIM = 6, 64, 128
    RATIO = 0.75
    REM = int(NUM_PATCHES * (1.0 - RATIO))     # 16 visible patches

    patches = jax.random.normal(k_patch, (B, NUM_PATCHES, EMB_DIM), jnp.float32)
    fwd_idx, bwd_idx = random_indexes(k_perm, B, NUM_PATCHES)

    remaining, f_idx, b_idx = patch_shuffle_forward(
        patches, fwd_idx, bwd_idx, ratio=RATIO)
    jax.block_until_ready((remaining, f_idx, b_idx))

    # shape / semantics checks against a plain-JAX reference gather
    assert remaining.shape == (B, REM, EMB_DIM)
    assert f_idx.shape == (B, NUM_PATCHES) and b_idx.shape == (B, NUM_PATCHES)
    ref = jnp.take_along_axis(patches, fwd_idx[:, :REM, None], axis=1)
    assert bool(jnp.allclose(remaining, ref, atol=1e-6))
    inv = jnp.take_along_axis(fwd_idx, bwd_idx, axis=1)           # inverse perm
    assert bool(jnp.all(inv == jnp.arange(NUM_PATCHES, dtype=jnp.int32)[None, :]))
    assert bool(jnp.all(jnp.isfinite(remaining)))

    print("KERNEL_OK")
</pallas_src>

<mosaic_0001>
module attributes {stable_mosaic.version = 11 : i64} {
  func.func @_shuffle_gather_kernel(%arg0: i32, %arg1: memref<4x16x1xi32, #tpu.memory_space<vmem>>, %arg2: memref<4x64x128xf32, #tpu.memory_space<vmem>>, %arg3: memref<4x16x128xf32, #tpu.memory_space<vmem>>) attributes {dimension_semantics = [#tpu.dimension_semantics<parallel>], iteration_bounds = array<i64: 2>, scalar_prefetch = 0 : i64, scratch_operands = 0 : i64, tpu.core_type = #tpu.core_type<tc>, window_params = [{transform_indices = @transform_0, window_bounds = array<i64: 4, 16, 1>}, {transform_indices = @transform_1, window_bounds = array<i64: 4, 64, 128>}, {transform_indices = @transform_2, window_bounds = array<i64: 4, 16, 128>}]} {
    %c0 = arith.constant 0 : index
    %c0_0 = arith.constant 0 : index
    %c0_1 = arith.constant 0 : index
    %0 = vector.load %arg1[%c0, %c0_0, %c0_1] : memref<4x16x1xi32, #tpu.memory_space<vmem>>, vector<4x16x1xi32>
    %1 = tpu.iota {dimensions = array<i32: 2>} : vector<4x16x64xi32>
    %2 = vector.broadcast %0 : vector<4x16x1xi32> to vector<4x16x64xi32>
    %3 = arith.cmpi eq, %1, %2 : vector<4x16x64xi32>
    %4 = arith.extui %3 : vector<4x16x64xi1> to vector<4x16x64xi32>
    %5 = arith.sitofp %4 : vector<4x16x64xi32> to vector<4x16x64xf32>
    %c0_2 = arith.constant 0 : index
    %c0_3 = arith.constant 0 : index
    %c0_4 = arith.constant 0 : index
    %6 = vector.load %arg2[%c0_2, %c0_3, %c0_4] : memref<4x64x128xf32, #tpu.memory_space<vmem>>, vector<4x64x128xf32>
    "tpu.trace_start"() <{level = 10 : i32, message = "brn,bnc->brc"}> : () -> ()
    %cst = arith.constant dense<0.000000e+00> : vector<4x16x128xf32>
    %7 = tpu.matmul %5, %6, %cst {dimension_numbers = #tpu.dot_dimension_numbers<[2], [1], [1], [2], [0, 0, 0, 1, 1, 2], [0], [0]>} : vector<4x16x64xf32>, vector<4x64x128xf32>, vector<4x16x128xf32> -> vector<4x16x128xf32>
    "tpu.trace_stop"() : () -> ()
    %c0_5 = arith.constant 0 : index
    %c0_6 = arith.constant 0 : index
    %c0_7 = arith.constant 0 : index
    %8 = vector.load %arg3[%c0_5, %c0_6, %c0_7] : memref<4x16x128xf32, #tpu.memory_space<vmem>>, vector<4x16x128xf32>
    tpu.vector_store %arg3[%c0_5, %c0_6, %c0_7], %7 {strides = array<i32>} : memref<4x16x128xf32, #tpu.memory_space<vmem>>, vector<4x16x128xf32>,
    return
  }
  func.func @transform_0(%arg0: i32) -> (i32, i32, i32) {
    %c0_i32 = arith.constant 0 : i32
    %c0_i32_0 = arith.constant 0 : i32
    %c0_i32_1 = arith.constant 0 : i32
    return %arg0, %c0_i32, %c0_i32_0 : i32, i32, i32
  }
  func.func @transform_1(%arg0: i32) -> (i32, i32, i32) {
    %c0_i32 = arith.constant 0 : i32
    %c0_i32_0 = arith.constant 0 : i32
    %c0_i32_1 = arith.constant 0 : i32
    return %arg0, %c0_i32, %c0_i32_0 : i32, i32, i32
  }
  func.func @transform_2(%arg0: i32) -> (i32, i32, i32) {
    %c0_i32 = arith.constant 0 : i32
    %c0_i32_0 = arith.constant 0 : i32
    %c0_i32_1 = arith.constant 0 : i32
    return %arg0, %c0_i32, %c0_i32_0 : i32, i32, i32
  }
}

</mosaic_0001>

<bundles_post_ra>
// kernel: patch_shuffle_forward.1
= control target key start
LH: loop header
LB: loop body
LE: loop exit
PB: predicated region body
PF: predicated region fallthrough
CT: control target
= control target key end

     0   :  { %s922_s9 = smov 0   ;;  %s1012_s0 = inlined_call_operand.vmem [shape: s32[8,16,1], index: 0, kind: input, shape index: {}]   ;;  %s1013_s1 = inlined_call_operand.vmem [shape: f32[8,64,128], index: 1, kind: input, shape index: {}]   ;;  %s1014_s2 = inlined_call_operand.vmem [shape: f32[8,16,128], index: 2, kind: output, shape index: {}]  }
   0x1 LB: > { %s670_s10 = sadd.s32 4294967295, %s903_s9   ;;  %p674_p0 = scmp.ge.s32.totalorder %s903_s9, 1  ;;  %s903_s9 = sphi %s922_s9, %s12_s9  }
   0x2   : > { %p126_p1 = scmp.lt.s32.totalorder %s903_s9, 3 }
   0x4   : > { %p127_p2 = pnand %p674_p0, %p126_p1 }
   0x5   : > { %s675_s11 = sshll.u32 (!%p127_p2), %s670_s10, 2  ;;  %v905_v0 = vmov (!%p127_p2), 0   ;;  %v185_v39 = vlaneseq (!%p127_p2)  ;;  %vm267_vm0 = vcmask (!%p127_p2), 523264   ;;  %v906_v44 = vmov (!%p127_p2), 0.0  }
   0x6   : > { %130 = sbr.rel (%p127_p2) target bundleno = 381 (0x17d), region = 28  ;;  %896 = vset.pattern.permute.xlu1 (!%p127_p2), %v905_v0  ;;  %895 = vset.pattern.permute.xlu0 (!%p127_p2), %v905_v0  ;;  %p157_p3 = scmp.lt.s32.totalorder (!%p127_p2), %s675_s11, 7 }
   0x7   : > { %v974_v40 = vand.u32 (!%p127_p2), 127, %v185_v39 }
   0xd   : > { %s1016_s11 = smov (!%p157_p3, %s675_s11), 7 }
   0xe   : > { %s702_s12 = sshll.u32 %s1016_s11, 4  ;;  %s703_s13 = sshll.u32 %s1016_s11, 6 }
   0xf   : > { %s939_s16 = scalar_lea.vmem %s1012_s0, %s702_s12  ;;  %s944_s19 = scalar_lea.vmem %s1013_s1, %s703_s13 }
  0x10   : > { %v179_v1 = vld [vmem:[%s939_s16 + $0x10] sm:$0xff]  ;;  %v177_v2 = vld [vmem:[%s939_s16] sm:$0xff]  ;;  %v180_v3 = vld [vmem:[%s939_s16 + $0x18] sm:$0xff]  ;;  %s175_s22 = scalar_lea.vmem %s1014_s2, %s702_s12 }
  0x11   : > { %194 = vperm.xlu1 %896, %v179_v1   ;;  %188 = vperm.xlu0 %895, %v177_v2   ;;  %v178_v4 = vld [vmem:[%s939_s16 + $0x8] sm:$0xff]  ;;  %v235_v5 = vld [vmem:[%s944_s19] sm:$0xff]  ;;  %v237_v12 = vld [vmem:[%s944_s19 + $0x10] sm:$0xff] }
  0x12   : > { %v236_v6 = vld [vmem:[%s944_s19 + $0x8] sm:$0xff]  ;;  %v243_v7 = vld [vmem:[%s944_s19 + $0x40] sm:$0xff]  ;;  %v238_v13 = vld [vmem:[%s944_s19 + $0x18] sm:$0xff] }
  0x13   : > { %v244_v8 = vld [vmem:[%s944_s19 + $0x48] sm:$0xff]  ;;  %v821_v10 = vpack.c.bf16 %v236_v6, %v235_v5  ;;  %v245_v14 = vld [vmem:[%s944_s19 + $0x50] sm:$0xff]  ;;  %v825_v15 = vpack.c.bf16 %v238_v13, %v237_v12  ;;  %v246_v16 = vld [vmem:[%s944_s19 + $0x58] sm:$0xff] }
  0x14   : > { %v182_v9 = vld [vmem:[%s939_s16 + $0x28] sm:$0xff]  ;;  %v837_v11 = vpack.c.bf16 %v244_v8, %v243_v7  ;;  %v239_v17 = vld [vmem:[%s944_s19 + $0x20] sm:$0xff]  ;;  %v841_v20 = vpack.c.bf16 %v246_v16, %v245_v14  ;;  %v241_v25 = vld [vmem:[%s944_s19 + $0x30] sm:$0xff] }
  0x15   : > { %197 = vperm.xlu1 %896, %v180_v3   ;;  %191 = vperm.xlu0 %895, %v178_v4   ;;  %v240_v18 = vld [vmem:[%s944_s19 + $0x28] sm:$0xff]  ;;  %v181_v19 = vld [vmem:[%s939_s16 + $0x20] sm:$0xff]  ;;  %v242_v26 = vld [vmem:[%s944_s19 + $0x38] sm:$0xff] }
  0x16   : > { %822 = vmatprep.subr.bf16.mxu0 %v821_v10  ;;  %838 = vmatprep.subr.bf16.mxu1 %v837_v11  ;;  %v247_v21 = vld [vmem:[%s944_s19 + $0x60] sm:$0xff]  ;;  %v248_v22 = vld [vmem:[%s944_s19 + $0x68] sm:$0xff]  ;;  %v829_v23 = vpack.c.bf16 %v240_v18, %v239_v17  ;;  %v249_v27 = vld [vmem:[%s944_s19 + $0x70] sm:$0xff]  ;;  %v833_v31 = vpack.c.bf16 %v242_v26, %v241_v25 }
  0x17   : > { %824 = vmatpush3.bf16.msra.mxu0 %v821_v10  ;;  %840 = vmatpush3.bf16.msra.mxu1 %v837_v11  ;;  %v845_v24 = vpack.c.bf16 %v248_v22, %v247_v21  ;;  %v250_v28 = vld [vmem:[%s944_s19 + $0x78] sm:$0xff]  ;;  %v183_v30 = vld [vmem:[%s939_s16 + $0x30] sm:$0xff]  ;;  %v251_v33 = vld [vmem:[%s944_s19 + $0x80] sm:$0xff] }
  0x18   : > { %826 = vmatprep.subr.bf16.mxu0 %v825_v15  ;;  %842 = vmatprep.subr.bf16.mxu1 %v841_v20  ;;  %v184_v29 = vld [vmem:[%s939_s16 + $0x38] sm:$0xff]  ;;  %v849_v32 = vpack.c.bf16 %v250_v28, %v249_v27  ;;  %v252_v34 = vld [vmem:[%s944_s19 + $0x88] sm:$0xff]  ;;  %v259_v35 = vld [vmem:[%s944_s19 + $0xc0] sm:$0xff] }
  0x19   : > { %203 = vperm.xlu1 %896, %v182_v9   ;;  %200 = vperm.xlu0 %895, %v181_v19   ;;  %v260_v36 = vld [vmem:[%s944_s19 + $0xc8] sm:$0xff]  ;;  %v853_v37 = vpack.c.bf16 %v252_v34, %v251_v33  ;;  %v253_v43 = vld [vmem:[%s944_s19 + $0x90] sm:$0xff]  ;;  %v254_v47 = vld [vmem:[%s944_s19 + $0x98] sm:$0xff] }
  0x1a   : > { %v869_v38 = vpack.c.bf16 %v260_v36, %v259_v35  ;;  %v261_v48 = vld [vmem:[%s944_s19 + $0xd0] sm:$0xff]  ;;  %v262_v49 = vld [vmem:[%s944_s19 + $0xd8] sm:$0xff]  ;;  %v857_v52 = vpack.c.bf16 %v254_v47, %v253_v43  ;;  %v255_v54 = vld [vmem:[%s944_s19 + $0xa0] sm:$0xff] }
  0x1b   : > { %828 = vmatpush3.bf16.msra.mxu0 %v825_v15  ;;  %844 = vmatpush3.bf16.msra.mxu1 %v841_v20  ;;  %v873_v53 = vpack.c.bf16 %v262_v49, %v261_v48  ;;  %v256_v57 = vld [vmem:[%s944_s19 + $0xa8] sm:$0xff]  ;;  %v263_v58 = vld [vmem:[%s944_s19 + $0xe0] sm:$0xff]  ;;  %v257_v63 = vld [vmem:[%s944_s19 + $0xb0] sm:$0xff] }
  0x1c   : > { %830 = vmatprep.subr.bf16.mxu0 %v829_v23  ;;  %846 = vmatprep.subr.bf16.mxu1 %v845_v24  ;;  %v264_v59 = vld [vmem:[%s944_s19 + $0xe8] sm:$0xff]  ;;  %v861_v61 = vpack.c.bf16 %v256_v57, %v255_v54  ;;  %v258_v2 = vld [vmem:[%s944_s19 + $0xb8] sm:$0xff]  ;;  %v265_v3 = vld [vmem:[%s944_s19 + $0xf0] sm:$0xff] }
  0x1d   : > { %209 = vperm.xlu1 %896, %v184_v29   ;;  %206 = vperm.xlu0 %895, %v183_v30   ;;  %v877_v62 = vpack.c.bf16 %v264_v59, %v263_v58  ;;  %v266_v4 = vld [vmem:[%s944_s19 + $0xf8] sm:$0xff]  ;;  %v865_v6 = vpack.c.bf16 %v258_v2, %v257_v63 }
  0x1e   : > { %v881_v7 = vpack.c.bf16 %v266_v4, %v265_v3 }
  0x1f   : > { %832 = vmatpush3.bf16.msra.mxu0 %v829_v23  ;;  %848 = vmatpush3.bf16.msra.mxu1 %v845_v24 }
  0x20   : > { %834 = vmatprep.subr.bf16.mxu0 %v833_v31  ;;  %850 = vmatprep.subr.bf16.mxu1 %v849_v32 }
  0x23   : > { %836 = vmatpush3.bf16.msra.mxu0 %v833_v31  ;;  %852 = vmatpush3.bf16.msra.mxu1 %v849_v32 }
  0x24   : > { %854 = vmatprep.subr.bf16.mxu0 %v853_v37  ;;  %870 = vmatprep.subr.bf16.mxu1 %v869_v38 }
  0x90   : > { %v195_v41 = vpop.permute.xlu1 %194  ;;  %v189_v42 = vpop.permute.xlu0 %188 }
  0x91   : > { %vm213_vm1 = vcmp.eq.s32.totalorder %v974_v40, %v195_v41  ;;  %vm211_vm2 = vcmp.eq.s32.totalorder %v974_v40, %v189_v42 }
  0x92   : > { %v684_v45 = vsel %vm211_vm2, 1.0, %v906_v44  ;;  %v686_v46 = vsel %vm213_vm1, 1.0, %v906_v44 }
  0x93   : > { %761 = vmatprep.mubr.msk.f32.mxu0 %vm267_vm0, %v684_v45  ;;  %780 = vmatprep.mubr.msk.f32.mxu1 %vm267_vm0, %v686_v46 }
  0x94   : > { %v198_v50 = vpop.permute.xlu1 %197  ;;  %v192_v51 = vpop.permute.xlu0 %191 }
  0x95   : > { %vm214_vm3 = vcmp.eq.s32.totalorder %v974_v40, %v198_v50  ;;  %vm212_vm4 = vcmp.eq.s32.totalorder %v974_v40, %v192_v51 }
  0x96   : > { %v687_v55 = vsel %vm214_vm3, 1.0, %v906_v44  ;;  %v685_v56 = vsel %vm212_vm4, 1.0, %v906_v44 }
  0x97   : > { %762 = vmatmul.mubr.msk.f32.vlgmr.msra.gmra.mrb[0].mxu0 %vm267_vm0, %v685_v56  ;;  %781 = vmatmul.mubr.msk.f32.vlgmr.msra.gmra.mrb[0].mxu1 %vm267_vm0, %v687_v55 }
  0x98   : > { %856 = vmatpush3.bf16.msra.mxu0 %v853_v37  ;;  %872 = vmatpush3.bf16.msra.mxu1 %v869_v38  ;;  %v201_v60 = vpop.permute.xlu0 %200  ;;  %v204_v0 = vpop.permute.xlu1 %203 }
  0x99   : > { %vm215_vm5 = vcmp.eq.s32.totalorder %v974_v40, %v201_v60  ;;  %858 = vmatprep.subr.bf16.mxu0 %v857_v52  ;;  %874 = vmatprep.subr.bf16.mxu1 %v873_v53  ;;  %vm216_vm7 = vcmp.eq.s32.totalorder %v974_v40, %v204_v0 }
  0x9a   : > { %v688_v1 = vsel %vm215_vm5, 1.0, %v906_v44  ;;  %v689_v10 = vsel %vm216_vm7, 1.0, %v906_v44 }
  0x9b   : > { %799 = vmatprep.mubr.msk.f32.mxu0 %vm267_vm0, %v688_v1 }
  0x9c   : > { %860 = vmatpush3.bf16.msra.mxu0 %v857_v52  ;;  %876 = vmatpush3.bf16.msra.mxu1 %v873_v53  ;;  %v207_v5 = vpop.permute.xlu0 %206  ;;  %v210_v9 = vpop.permute.xlu1 %209 }
  0x9d   : > { %vm217_vm6 = vcmp.eq.s32.totalorder %v974_v40, %v207_v5  ;;  %862 = vmatprep.subr.bf16.mxu0 %v861_v61  ;;  %878 = vmatprep.subr.bf16.mxu1 %v877_v62  ;;  %vm218_vm8 = vcmp.eq.s32.totalorder %v974_v40, %v210_v9 }
  0x9e   : > { %v690_v8 = vsel %vm217_vm6, 1.0, %v906_v44  ;;  %v691_v11 = vsel %vm218_vm8, 1.0, %v906_v44 }
  0x9f   : > { %818 = vmatprep.mubr.msk.f32.mxu1 %vm267_vm0, %v690_v8 }
  0xa0   : > { %864 = vmatpush3.bf16.msra.mxu0 %v861_v61  ;;  %880 = vmatpush3.bf16.msra.mxu1 %v877_v62 }
  0xa1   : > { %866 = vmatprep.subr.bf16.mxu0 %v865_v6  ;;  %882 = vmatprep.subr.bf16.mxu1 %v881_v7 }
  0xa4   : > { %868 = vmatpush3.bf16.msra.mxu0 %v865_v6  ;;  %884 = vmatpush3.bf16.msra.mxu1 %v881_v7 }
  0xa7   : > { %800 = vmatmul.mubr.msk.f32.vlgmr.msra.gmra.mrb[2].mxu0 %vm267_vm0, %v689_v10  ;;  %819 = vmatmul.mubr.msk.f32.vlgmr.msra.gmra.mrb[2].mxu1 %vm267_vm0, %v691_v11 }
 0x16a   : > { %v763_v12 = vpop.f32.mrb[0].mxu0  ;;  %v782_v13 = vpop.f32.mrb[0].mxu1 }
 0x16b   : > { %593 = vst [vmem:[%s175_s22 + $0x8] sm:$0xff] %v763_v12  ;;  %v340_v14 = vpop.f32.mrb[1].mxu0  ;;  %v421_v15 = vpop.f32.mrb[1].mxu1  ;;  %595 = vst [vmem:[%s175_s22 + $0x18] sm:$0xff] %v782_v13 }
 0x16c   : > { %592 = vst [vmem:[%s175_s22] sm:$0xff] %v340_v14  ;;  %594 = vst [vmem:[%s175_s22 + $0x10] sm:$0xff] %v421_v15 }
 0x17a   : > { %v801_v16 = vpop.f32.mrb[2].mxu0  ;;  %v820_v17 = vpop.f32.mrb[2].mxu1 }
 0x17b   : > { %597 = vst [vmem:[%s175_s22 + $0x28] sm:$0xff] %v801_v16  ;;  %v502_v18 = vpop.f32.mrb[3].mxu0  ;;  %v583_v19 = vpop.f32.mrb[3].mxu1  ;;  %599 = vst [vmem:[%s175_s22 + $0x38] sm:$0xff] %v820_v17 }
 0x17c   : > { %596 = vst [vmem:[%s175_s22 + $0x20] sm:$0xff] %v502_v18  ;;  %598 = vst [vmem:[%s175_s22 + $0x30] sm:$0xff] %v583_v19 }
 0x17d PF: > { %s12_s9 = sadd.s32 1, %s903_s9  }
 0x17e   : > { %p9_p4 = scmp.ge.s32.totalorder %s12_s9, 4  }
 0x180   :  { %11 = sbr.rel (!%p9_p4) target bundleno = 1 (0x1), region = 61 }

</bundles_post_ra>
